<compile_context>
chip_gen: v7x
topology: tpu7x:2x2x1
jax: 0.10.0
libtpu: 0.0.40
codegen_flags: <defaults>
</compile_context>

<pallas_src>
import functools

import jax
import jax.numpy as jnp
from jax.experimental import pallas as pl
from jax.experimental.pallas import tpu as pltpu

LANE = 128


def _round_up(v, m):
    return ((v + m - 1) // m) * m


def _pick_tile(n, preferred):
    for t in preferred:
        if t <= n and n % t == 0:
            return t
    return n


# ----------------------------------------------------------------------------- 
# Kernel 1: per-node feature transform  h = x @ Wl^T ,  s = x @ Wr^T + b
# -----------------------------------------------------------------------------
def _transform_kernel(x_ref, wl_ref, wr_ref, b_ref, h_ref, s_ref):
    x = x_ref[...]
    h = jnp.dot(x, wl_ref[...], preferred_element_type=jnp.float32)
    s = jnp.dot(x, wr_ref[...], preferred_element_type=jnp.float32) + b_ref[...]
    h_ref[...] = h.astype(h_ref.dtype)
    s_ref[...] = s.astype(s_ref.dtype)


def sage_transform(x, wl_t, wr_t, bias, *, tile_n):
    N, fin = x.shape
    fout = wl_t.shape[1]
    assert N % tile_n == 0

    flops = 2 * 2 * N * fin * fout
    bytes_accessed = (N * fin * x.dtype.itemsize
                      + 2 * fin * fout * wl_t.dtype.itemsize
                      + N * fout * (2 + 4))

    return pl.pallas_call(
        _transform_kernel,
        out_shape=(jax.ShapeDtypeStruct((N, fout), jnp.bfloat16),
                   jax.ShapeDtypeStruct((N, fout), jnp.float32)),
        grid_spec=pltpu.PrefetchScalarGridSpec(
            num_scalar_prefetch=0,
            grid=(N // tile_n,),
            in_specs=[
                pl.BlockSpec((tile_n, fin), lambda i: (i, 0)),   # x row tile
                pl.BlockSpec((fin, fout), lambda i: (0, 0)),     # W_l^T (padded)
                pl.BlockSpec((fin, fout), lambda i: (0, 0)),     # W_r^T (padded)
                pl.BlockSpec((1, fout), lambda i: (0, 0)),       # bias  (padded)
            ],
            out_specs=[
                pl.BlockSpec((tile_n, fout), lambda i: (i, 0)),  # h
                pl.BlockSpec((tile_n, fout), lambda i: (i, 0)),  # s
            ],
        ),
        compiler_params=pltpu.CompilerParams(
            dimension_semantics=("parallel",)),
        cost_estimate=pl.CostEstimate(flops=flops, transcendentals=0,
                                      bytes_accessed=bytes_accessed),
    )(x, wl_t, wr_t, bias)


# -----------------------------------------------------------------------------
# Kernel 2: neighbor aggregation  out = A_mean @ h + s (+ ReLU)
# K-tiled contraction with f32 accumulator scratch.
# -----------------------------------------------------------------------------
def _aggregate_kernel(a_ref, h_ref, s_ref, o_ref, acc_ref, *, apply_relu):
    @pl.when(pl.program_id(1) == 0)
    def _():
        acc_ref[...] = jnp.zeros_like(acc_ref)

    acc_ref[...] += jnp.dot(a_ref[...], h_ref[...],
                            preferred_element_type=jnp.float32)

    @pl.when(pl.program_id(1) == pl.num_programs(1) - 1)
    def _():
        out = acc_ref[...] + s_ref[...]
        if apply_relu:
            out = jnp.maximum(out, 0.0)
        o_ref[...] = out.astype(o_ref.dtype)


def sage_aggregate(a, h, s, *, apply_relu, out_dtype, tile_n, tile_k):
    N = a.shape[0]
    fout = h.shape[1]
    assert N % tile_n == 0 and N % tile_k == 0

    kernel = functools.partial(_aggregate_kernel, apply_relu=apply_relu)
    flops = 2 * N * N * fout
    bytes_accessed = (N * N * a.dtype.itemsize
                      + N * fout * (h.dtype.itemsize + s.dtype.itemsize)
                      + N * fout * jnp.dtype(out_dtype).itemsize)

    return pl.pallas_call(
        kernel,
        out_shape=jax.ShapeDtypeStruct((N, fout), out_dtype),
        grid_spec=pltpu.PrefetchScalarGridSpec(
            num_scalar_prefetch=0,
            grid=(N // tile_n, N // tile_k),
            in_specs=[
                pl.BlockSpec((tile_n, tile_k), lambda i, k: (i, k)),  # A tile
                pl.BlockSpec((tile_k, fout), lambda i, k: (k, 0)),    # h tile
                pl.BlockSpec((tile_n, fout), lambda i, k: (i, 0)),    # self part
            ],
            out_specs=pl.BlockSpec((tile_n, fout), lambda i, k: (i, 0)),
            scratch_shapes=[pltpu.VMEM((tile_n, fout), jnp.float32)],
        ),
        compiler_params=pltpu.CompilerParams(
            dimension_semantics=("parallel", "arbitrary")),
        cost_estimate=pl.CostEstimate(flops=flops, transcendentals=0,
                                      bytes_accessed=bytes_accessed),
    )(a, h, s)


# -----------------------------------------------------------------------------
# Parameters (PyG SAGEConv layout: lin_l with bias, lin_r without)
# -----------------------------------------------------------------------------
def init_sage_params(key, in_channels, hidden_channels, out_channels, num_layers):
    dims = [in_channels] + [hidden_channels] * (num_layers - 1) + [out_channels]
    params = []
    for layer in range(num_layers):
        fin, fout = dims[layer], dims[layer + 1]
        key, k1, k2, k3 = jax.random.split(key, 4)
        scale = 1.0 / jnp.sqrt(fin)
        w_l = jax.random.uniform(k1, (fout, fin), jnp.float32, -scale, scale)
        w_r = jax.random.uniform(k2, (fout, fin), jnp.float32, -scale, scale)
        b_l = jax.random.uniform(k3, (fout,), jnp.float32, -scale, scale)
        params.append((w_l, w_r, b_l))
    return params


def pad_params_for_kernel(params, lane=LANE):
    """Transpose, zero-pad feature dims to multiples of `lane`, cast weights bf16."""
    padded = []
    for (w_l, w_r, b_l) in params:
        fout, fin = w_l.shape
        fin_p, fout_p = _round_up(fin, lane), _round_up(fout, lane)
        wl_t = jnp.zeros((fin_p, fout_p), jnp.bfloat16)
        wl_t = wl_t.at[:fin, :fout].set(w_l.T.astype(jnp.bfloat16))
        wr_t = jnp.zeros((fin_p, fout_p), jnp.bfloat16)
        wr_t = wr_t.at[:fin, :fout].set(w_r.T.astype(jnp.bfloat16))
        bias = jnp.zeros((1, fout_p), jnp.float32).at[0, :fout].set(b_l)
        padded.append((wl_t, wr_t, bias))
    return padded


# -----------------------------------------------------------------------------
# Forward pass
# -----------------------------------------------------------------------------
def sage_forward(x, a_norm, params, *, tile_n=None, tile_k=None):
    N, fin = x.shape
    n_layers = len(params)
    out_channels = params[-1][0].shape[0]
    padded_params = pad_params_for_kernel(params)

    if tile_n is None:
        tile_n = _pick_tile(N, (256, 128, 64, 32, 16, 8))
    if tile_k is None:
        tile_k = _pick_tile(N, (512, 256, 128, 64, 32, 16, 8))

    # Pad node features once to the first layer's padded Fin and cast to bf16.
    fin_p = padded_params[0][0].shape[0]
    h = jnp.zeros((N, fin_p), jnp.bfloat16).at[:, :fin].set(x.astype(jnp.bfloat16))
    a_bf16 = a_norm.astype(jnp.bfloat16)

    for li, (wl_t, wr_t, bias) in enumerate(padded_params):
        last = li == n_layers - 1
        hl, sl = sage_transform(h, wl_t, wr_t, bias, tile_n=tile_n)
        h = sage_aggregate(a_bf16, hl, sl,
                           apply_relu=not last,
                           out_dtype=jnp.float32 if last else jnp.bfloat16,
                           tile_n=tile_n, tile_k=tile_k)
        # dropout skipped (inference mode)
    return h[:, :out_channels]


# -----------------------------------------------------------------------------
# References
# -----------------------------------------------------------------------------
def reference_forward_f32(x, a_norm, params):
    h = x
    n_layers = len(params)
    for li, (w_l, w_r, b_l) in enumerate(params):
        out = (a_norm @ h) @ w_l.T + h @ w_r.T + b_l
        if li != n_layers - 1:
            out = jnp.maximum(out, 0.0)
        h = out
    return h


def reference_forward_bf16(x, a_norm, params):
    """Emulates the kernel's bf16-input / f32-accumulation numerics."""
    a = a_norm.astype(jnp.bfloat16)
    h = x.astype(jnp.bfloat16)
    n_layers = len(params)
    for li, (w_l, w_r, b_l) in enumerate(params):
        wl = w_l.T.astype(jnp.bfloat16)
        wr = w_r.T.astype(jnp.bfloat16)
        hl = jnp.dot(h, wl, preferred_element_type=jnp.float32).astype(jnp.bfloat16)
        s = jnp.dot(h, wr, preferred_element_type=jnp.float32) + b_l
        out = jnp.dot(a, hl, preferred_element_type=jnp.float32) + s
        if li != n_layers - 1:
            out = jnp.maximum(out, 0.0)
            h = out.astype(jnp.bfloat16)
        else:
            h = out
    return h


if __name__ == "__main__":
    key = jax.random.PRNGKey(0)
    key, kx, ka, kp = jax.random.split(key, 4)

    # Small synthetic graph: N nodes, dense row-normalized adjacency (mean agg).
    N = 256
    in_channels, hidden_channels, out_channels = 32, 32, 16
    num_layers = 3
    dropout = 0.5  # no-op at inference

    x = jax.random.normal(kx, (N, in_channels), jnp.float32)

    adj = (jax.random.uniform(ka, (N, N)) < 0.05).astype(jnp.float32)
    adj = adj * (1.0 - jnp.eye(N, dtype=jnp.float32))  # no self loops
    deg = jnp.sum(adj, axis=1, keepdims=True)
    a_norm = adj / jnp.maximum(deg, 1.0)

    params = init_sage_params(kp, in_channels, hidden_channels, out_channels, num_layers)

    out = sage_forward(x, a_norm, params, tile_n=128, tile_k=128)
    out = jax.block_until_ready(out)

    assert out.shape == (N, out_channels)

    ref_bf16 = reference_forward_bf16(x, a_norm, params)
    ref_f32 = reference_forward_f32(x, a_norm, params)
    assert jnp.allclose(out, ref_bf16, atol=2e-2, rtol=2e-2), "mismatch vs bf16-matched reference"
    assert jnp.allclose(out, ref_f32, atol=1e-1, rtol=1e-1), "mismatch vs f32 reference"

    print("KERNEL_OK")
</pallas_src>

<mosaic_0001>
module attributes {stable_mosaic.version = 11 : i64} {
  func.func @_transform_kernel(%arg0: i32, %arg1: memref<128x128xbf16, #tpu.memory_space<vmem>>, %arg2: memref<128x128xbf16, #tpu.memory_space<vmem>>, %arg3: memref<128x128xbf16, #tpu.memory_space<vmem>>, %arg4: memref<1x128xf32, #tpu.memory_space<vmem>>, %arg5: memref<128x128xbf16, #tpu.memory_space<vmem>>, %arg6: memref<128x128xf32, #tpu.memory_space<vmem>>) attributes {dimension_semantics = [#tpu.dimension_semantics<parallel>], iteration_bounds = array<i64: 2>, scalar_prefetch = 0 : i64, scratch_operands = 0 : i64, tpu.core_type = #tpu.core_type<tc>, window_params = [{transform_indices = @transform_0, window_bounds = array<i64: 128, 128>}, {pipeline_mode = #tpu.pipeline_mode<synchronous>, transform_indices = @transform_1, window_bounds = array<i64: 128, 128>}, {pipeline_mode = #tpu.pipeline_mode<synchronous>, transform_indices = @transform_2, window_bounds = array<i64: 128, 128>}, {pipeline_mode = #tpu.pipeline_mode<synchronous>, transform_indices = @transform_3, window_bounds = array<i64: 1, 128>}, {transform_indices = @transform_4, window_bounds = array<i64: 128, 128>}, {transform_indices = @transform_5, window_bounds = array<i64: 128, 128>}]} {
    %c0 = arith.constant 0 : index
    %c0_0 = arith.constant 0 : index
    %0 = vector.load %arg1[%c0, %c0_0] : memref<128x128xbf16, #tpu.memory_space<vmem>>, vector<128x128xbf16>
    %c0_1 = arith.constant 0 : index
    %c0_2 = arith.constant 0 : index
    %1 = vector.load %arg2[%c0_1, %c0_2] : memref<128x128xbf16, #tpu.memory_space<vmem>>, vector<128x128xbf16>
    %cst = arith.constant dense<0.000000e+00> : vector<128x128xf32>
    %2 = tpu.matmul %0, %1, %cst {dimension_numbers = #tpu.dot_dimension_numbers<[1], [0], [0], [1], [0, 0, 1, 1], [], []>} : vector<128x128xbf16>, vector<128x128xbf16>, vector<128x128xf32> -> vector<128x128xf32>
    %c0_3 = arith.constant 0 : index
    %c0_4 = arith.constant 0 : index
    %3 = vector.load %arg3[%c0_3, %c0_4] : memref<128x128xbf16, #tpu.memory_space<vmem>>, vector<128x128xbf16>
    %cst_5 = arith.constant dense<0.000000e+00> : vector<128x128xf32>
    %4 = tpu.matmul %0, %3, %cst_5 {dimension_numbers = #tpu.dot_dimension_numbers<[1], [0], [0], [1], [0, 0, 1, 1], [], []>} : vector<128x128xbf16>, vector<128x128xbf16>, vector<128x128xf32> -> vector<128x128xf32>
    %c0_6 = arith.constant 0 : index
    %c0_7 = arith.constant 0 : index
    %5 = vector.load %arg4[%c0_6, %c0_7] : memref<1x128xf32, #tpu.memory_space<vmem>>, vector<1x128xf32>
    %6 = vector.broadcast %5 : vector<1x128xf32> to vector<128x128xf32>
    %7 = arith.addf %4, %6 : vector<128x128xf32>
    %8 = arith.truncf %2 : vector<128x128xf32> to vector<128x128xbf16>
    %c0_8 = arith.constant 0 : index
    %c0_9 = arith.constant 0 : index
    %9 = vector.load %arg5[%c0_8, %c0_9] : memref<128x128xbf16, #tpu.memory_space<vmem>>, vector<128x128xbf16>
    tpu.vector_store %arg5[%c0_8, %c0_9], %8 {strides = array<i32>} : memref<128x128xbf16, #tpu.memory_space<vmem>>, vector<128x128xbf16>,
    %c0_10 = arith.constant 0 : index
    %c0_11 = arith.constant 0 : index
    %10 = vector.load %arg6[%c0_10, %c0_11] : memref<128x128xf32, #tpu.memory_space<vmem>>, vector<128x128xf32>
    tpu.vector_store %arg6[%c0_10, %c0_11], %7 {strides = array<i32>} : memref<128x128xf32, #tpu.memory_space<vmem>>, vector<128x128xf32>,
    return
  }
  func.func @transform_0(%arg0: i32) -> (i32, i32) {
    %c0_i32 = arith.constant 0 : i32
    %c0_i32_0 = arith.constant 0 : i32
    return %arg0, %c0_i32 : i32, i32
  }
  func.func @transform_1(%arg0: i32) -> (i32, i32) {
    %c0_i32 = arith.constant 0 : i32
    %c0_i32_0 = arith.constant 0 : i32
    %c0_i32_1 = arith.constant 0 : i32
    return %c0_i32, %c0_i32_0 : i32, i32
  }
  func.func @transform_2(%arg0: i32) -> (i32, i32) {
    %c0_i32 = arith.constant 0 : i32
    %c0_i32_0 = arith.constant 0 : i32
    %c0_i32_1 = arith.constant 0 : i32
    return %c0_i32, %c0_i32_0 : i32, i32
  }
  func.func @transform_3(%arg0: i32) -> (i32, i32) {
    %c0_i32 = arith.constant 0 : i32
    %c0_i32_0 = arith.constant 0 : i32
    %c0_i32_1 = arith.constant 0 : i32
    return %c0_i32, %c0_i32_0 : i32, i32
  }
  func.func @transform_4(%arg0: i32) -> (i32, i32) {
    %c0_i32 = arith.constant 0 : i32
    %c0_i32_0 = arith.constant 0 : i32
    return %arg0, %c0_i32 : i32, i32
  }
  func.func @transform_5(%arg0: i32) -> (i32, i32) {
    %c0_i32 = arith.constant 0 : i32
    %c0_i32_0 = arith.constant 0 : i32
    return %arg0, %c0_i32 : i32, i32
  }
}

</mosaic_0001>

<bundles_post_ra>
// kernel: tpu_custom_call.1
= control target key start
LH: loop header
LB: loop body
LE: loop exit
PB: predicated region body
PF: predicated region fallthrough
CT: control target
= control target key end

     0   :  { %11 = vsyncpa [#allocation3], 0  ;;  %s1834_s0 = inlined_call_operand.hbm [shape: bf16[256,128], index: 0, kind: input, shape index: {}]   ;;  %s1835_s1 = inlined_call_operand.hbm [shape: bf16[128,128], index: 1, kind: input, shape index: {}]   ;;  %s1836_s2 = inlined_call_operand.hbm [shape: bf16[128,128], index: 2, kind: input, shape index: {}]   ;;  %s1837_s3 = inlined_call_operand.vmem [shape: f32[1,128], index: 3, kind: input, shape index: {}]   ;;  %s1838_s4 = inlined_call_operand.hbm [shape: bf16[256,128], index: 4, kind: output, shape index: {0}]   ;;  %s1839_s5 = inlined_call_operand.hbm [shape: f32[256,128], index: 5, kind: output, shape index: {1}]  }
   0x1   :  { %13 = vsyncpa [#allocation3 + $0x1], 0 }
   0x2   :  { %14 = vsyncpa [#allocation6], 0 }
   0x3   :  { %15 = vsyncpa [#allocation4], 0 }
   0x4   :  { %17 = vsyncpa [#allocation4 + $0x1], 0 }
   0x5   :  { %18 = vsyncpa [#allocation10], 0 }
   0x6   :  { %20 = vsyncpa [#allocation10 + $0x1], 0  ;;  %s1493_s18 = smov 0   ;;  %s1495_s19 = smov 0  }
   0x7   :  { %s1497_s20 = smov 0   ;;  %s1499_s21 = smov 0  }
   0x8 LB: > { %s1514_s22 = sadd.s32 4294967295, %s1450_s21   ;;  %s935_s23 = sadd.s32 4294967294, %s1450_s21   ;;  %s1450_s21 = sphi %s1499_s21, %s1859_s21   ;;  %s1446_s20 = sphi %s1497_s20, %s1858_s20   ;;  %s1442_s19 = sphi %s1495_s19, %s1857_s19   ;;  %s1438_s18 = sphi %s1493_s18, %s1856_s18  }
   0x9   : > { %p46_p0 = scmp.ne.s32.totalorder %s1442_s19, %s1438_s18  ;;  %p1840_p1 = scmp.eq.s32.totalorder %s1514_s22, 0 }
   0xa   : > { %p139_p3 = scmp.eq.s32.totalorder %s935_s23, 1  ;;  %p936_p5 = scmp.ge.s32.totalorder %s1450_s21, 1 }
   0xb   : > { %p1523_p4 = por %p1840_p1, %p46_p0  ;;  %p172_p7 = scmp.lt.s32.totalorder %s1450_s21, 3 }
   0xc   : > { %p1528_p6 = por %p139_p3, %p46_p0  ;;  %s1452_s27 = smov [#allocation5]  }
   0xd   : > { %s1843_s24 = scalar_select %p1523_p4, 1, 0 }
   0xe   : > { %s1844_s25 = scalar_select %p1528_p6, 1, 0 }
   0xf   : > { %p1533_p8 = pnand %p936_p5, %p172_p7  ;;  %s184_s28 = sshll.u32 %s1452_s27, 4  ;;  %s1537_s28 = int_to_ptr.vmem [resolvable:$true] %s184_s28 }
  0x10   : > { %s1453_s30 = smov [#allocation7]   ;;  %s1262_s9 = scalar_lea.hbm %s1835_s1, 1024 }
  0x11   : > { %p1174_p9 = pneg %p1533_p8  ;;  %s197_s6 = sshll.u32 %s1453_s30, 4  ;;  %s1548_s6 = int_to_ptr.vmem [resolvable:$true] %s197_s6 }
  0x12   : > { %p1263_p12 = scmp.ne.s32.totalorder %s1835_s1, %s1262_s9  ;;  %p1269_p5 = scmp.lt.u32.totalorder %s1262_s9, %s1835_s1 }
  0x13   : > { %p1544_p11 = pnand %p1174_p9, %p1840_p1 }
  0x15   : > { %p1264_p13 = pneg %p1544_p11 }
  0x17   : > { %p1265_p0 = pnand %p1264_p13, %p1263_p12 }
  0x19   : > { %p1266_p3 = pneg %p1265_p0 }
  0x1b   : > { %p1271_p7 = pnand %p1269_p5, %p1266_p3 }
  0x1d   : > { %1274 = shalt.err (!%p1271_p7)
}
  0x1e   : > { %s1275_s14 = scalar_lea.vmem %s1537_s28, 1024  ;;  %p1283_p2 = scmp.lt.s32.totalorder %s1537_s28, %s1537_s28 }
  0x1f   : > { %p1276_p9 = scmp.ne.s32.totalorder %s1537_s28, %s1275_s14  ;;  %p1284_p12 = scmp.lt.s32.totalorder %s1275_s14, %s1275_s14 }
  0x21   : > { %p1278_p10 = pnand %p1276_p9, %p1264_p13  ;;  %p1285_p0 = por %p1284_p12, %p1283_p2 }
  0x23   : > { %p1279_p1 = pneg %p1278_p10 }
  0x25   : > { %p1286_p6 = pnand %p1285_p0, %p1279_p1 }
  0x27   : > { %1289 = shalt.err (!%p1286_p6)
}
  0x28   : > { %s1454_s15 = smov 64   ;;  %s1455_s16 = smov 4  }
  0x29   : > { %1177 = dma.hbm_to_vmem [thread:$0]  (!%p1544_p11), %s1835_s1, 1024, %s1537_s28, [#allocation6], %s1454_s15, %s1454_s15, %s1455_s16  }
  0x2a   : > { %s1290_s7 = scalar_lea.hbm %s1836_s2, 1024 }
  0x2b   : > { %p1291_p1 = scmp.ne.s32.totalorder %s1836_s2, %s1290_s7  ;;  %p1297_p10 = scmp.lt.u32.totalorder %s1290_s7, %s1836_s2 }
  0x2d   : > { %p1293_p2 = pnand %p1291_p1, %p1264_p13 }
  0x2f   : > { %p1294_p6 = pneg %p1293_p2 }
  0x31   : > { %p1299_p3 = pnand %p1297_p10, %p1294_p6 }
  0x33   : > { %1302 = shalt.err (!%p1299_p3)
}
  0x34   : > { %s1303_s28 = scalar_lea.vmem %s1548_s6, 1024  ;;  %p1311_p12 = scmp.lt.s32.totalorder %s1548_s6, %s1548_s6 }
  0x35   : > { %p1304_p5 = scmp.ne.s32.totalorder %s1548_s6, %s1303_s28  ;;  %p1312_p0 = scmp.lt.s32.totalorder %s1303_s28, %s1303_s28 }
  0x37   : > { %p1306_p7 = pnand %p1304_p5, %p1264_p13  ;;  %p1313_p1 = por %p1312_p0, %p1311_p12 }
  0x39   : > { %p1307_p9 = pneg %p1306_p7 }
  0x3b   : > { %p1314_p2 = pnand %p1313_p1, %p1307_p9 }
  0x3d   : > { %1317 = shalt.err (!%p1314_p2)
}
  0x3e   : > { %1180 = dma.hbm_to_vmem [thread:$0]  (!%p1544_p11), %s1836_s2, 1024, %s1548_s6, [#allocation6], %s1454_s15, %s1454_s15, %s1455_s16  }
  0x3f   : > { %s1609_s29 = sadd.s32 1, %s1450_s21   ;;  %s33_s14 = sadd.s32 1, %s1446_s20 }
  0x40   : > { %s30_s17 = ssub.s32 %s1450_s21, %s1609_s29  ;;  %p40_p13 = scmp.ne.s32.totalorder %s1446_s20, %s1442_s19 }
  0x41   : > { %p31_p6 = scmp.eq.s32.totalorder %s30_s17, 0  ;;  %p41_p10 = scmp.eq.s32.totalorder %s1450_s21, 0 }
  0x42   : > { %p1847_p3 = scmp.eq.s32.totalorder %s1514_s22, 1  ;;  %p1194_p7 = scmp.lt.s32.totalorder %s1450_s21, 2 }
  0x43   : > { %s1625_s27 = scalar_select %p31_p6, %s1446_s20, %s33_s14  }
  0x44   : > { %p1619_p5 = por %p1847_p3, %p40_p13  ;;  %p42_p9 = por %p41_p10, %p40_p13 }
  0x45   : > { %s214_s30 = sand.u32 1, %s1446_s20   ;;  %s998_s6 = sshll.u32 %s1450_s21, 10 }
  0x46   : > { %s1848_s23 = scalar_select %p1619_p5, 1, 0 }
  0x47   : > { %s940_s7 = sshll.u32 %s214_s30, 6  ;;  %s1632_s10 = scalar_lea.hbm %s1834_s0, %s998_s6 }
  0x48   : > { %s218_s11 = scalar_lea.vmem [#allocation2], %s940_s7  ;;  %p1636_p11 = pnand %p1194_p7, %p42_p9 }
  0x49   : > { %s225_s28 = sshll.u32 %s218_s11, 4  ;;  %s1640_s13 = scalar_lea.sflag [#allocation3], %s214_s30  ;;  %s1634_s28 = int_to_ptr.vmem [resolvable:$true] %s225_s28 }
  0x4a   : > { %s1318_s14 = scalar_lea.hbm %s1632_s10, 1024  ;;  %p1320_p0 = pneg %p1636_p11 }
  0x4b   : > { %p1319_p12 = scmp.ne.s32.totalorder %s1632_s10, %s1318_s14  ;;  %s1323_s6 = scalar_lea.hbm %s1834_s0, 2048 }
  0x4c   : > { %p1324_p13 = scmp.lt.u32.totalorder %s1632_s10, %s1834_s0  ;;  %p1325_p6 = scmp.lt.u32.totalorder %s1323_s6, %s1318_s14 }
  0x4d   : > { %p1321_p1 = pnand %p1320_p0, %p1319_p12  ;;  %p1327_p3 = scmp.lt.u32.totalorder %s1318_s14, %s1632_s10 }
  0x4e   : > { %p1326_p10 = por %p1325_p6, %p1324_p13 }
  0x4f   : > { %p1322_p2 = pneg %p1321_p1 }
  0x50   : > { %p1328_p7 = por %p1327_p3, %p1326_p10 }
  0x52   : > { %p1329_p9 = pnand %p1328_p7, %p1322_p2 }
  0x54   : > { %1332 = shalt.err (!%p1329_p9)
}
  0x55   : > { %s1333_s30 = scalar_lea.vmem %s1634_s28, 1024  ;;  %s1456_s11 = smov [#allocation2]  }
  0x56   : > { %p1334_p12 = scmp.ne.s32.totalorder %s1634_s28, %s1333_s30  ;;  %s1338_s17 = sshll.u32 %s1456_s11, 4  ;;  %s1339_s17 = int_to_ptr.vmem [resolvable:$false] %s1338_s17 }
  0x57   : > { %s1340_s7 = scalar_lea.vmem %s1339_s17, 2048  ;;  %p1341_p4 = scmp.lt.s32.totalorder %s1634_s28, %s1339_s17 }
  0x58   : > { %p1336_p1 = pnand %p1334_p12, %p1320_p0  ;;  %p1342_p13 = scmp.lt.s32.totalorder %s1340_s7, %s1333_s30 }
  0x5a   : > { %p1337_p5 = pneg %p1336_p1  ;;  %p1343_p6 = por %p1342_p13, %p1341_p4 }
  0x5c   : > { %p1344_p10 = pnand %p1343_p6, %p1337_p5 }
  0x5e   : > { %1347 = shalt.err (!%p1344_p10)
}
  0x5f   : > { %1184 = dma.hbm_to_vmem [thread:$0]  (!%p1636_p11), %s1632_s10, 1024, %s1634_s28, %s1640_s13, %s1454_s15, %s1454_s15, %s1455_s16  }
  0x60   : > { %237 = sbr.rel (%p1533_p8) target bundleno = 421 (0x1a5), region = 36  ;;  %s1674_s14 = sand.u32 (!%p1533_p8), 1, %s1442_s19  }
  0x61   : > { %s944_s6 = sshll.u32 (!%p1533_p8), %s1674_s14, 6  ;;  %s240_s8 = scalar_lea.sflag (!%p1533_p8), [#allocation3], %s1674_s14 }
  0x62   : > { %s1680_s12 = scalar_lea.vmem (!%p1533_p8), [#allocation2], %s944_s6  ;;  %p1850_p4 = scmp.ne.s32.totalorder (!%p1533_p8), %s1843_s24, 0 }
  0x67   : > { %1421 = dma.done.wait (%p1850_p4), %s240_s8, 1024  }
  0x68   : > { %1423 = vsyncadd (%p1850_p4), %s240_s8, 4294966272  ;;  %p1851_p5 = scmp.eq.s32.totalorder %s1514_s22, 0 }
  0x6a   : > { %1425 = dma.done.wait (%p1851_p5), [#allocation6], 2048   ;;  %p1852_p8 = pmov %p1851_p5 }
  0x6b   : > { %v1238_v0 = vld [vmem:[#allocation5] sm:$0xff]   ;;  %v1240_v2 = vld [vmem:[#allocation5 + $0x8] sm:$0xff]   ;;  %v1242_v4 = vld [vmem:[#allocation5 + $0x10] sm:$0xff]   ;;  %s948_s24 = sshll.u32 %s1674_s14, 7  ;;  %s1713_s10 = scalar_lea.vmem [#allocation8], %s944_s6 }
  0x6c   : > { %1427 = vsyncadd (%p1852_p8), [#allocation6], 4294965248  ;;  %v1239_v1 = vld [vmem:[#allocation7] sm:$0xff]   ;;  %1096 = vmatprep.subr.bf16.mxu0 %v1238_v0  ;;  %v1241_v3 = vld [vmem:[#allocation7 + $0x8] sm:$0xff]   ;;  %s1706_s16 = scalar_lea.vmem [#allocation9], %s948_s24  ;;  %s795_s28 = sshll.u32 %s1713_s10, 4  ;;  %s1742_s28 = int_to_ptr.vmem [resolvable:$true] %s795_s28 }
  0x6d   : > { %1128 = vmatprep.subr.bf16.mxu1 %v1239_v1  ;;  %1097 = vmatpush3.bf16.msra.mxu0 %v1238_v0  ;;  %v1243_v5 = vld [vmem:[#allocation7 + $0x10] sm:$0xff]   ;;  %v1244_v6 = vld [vmem:[#allocation5 + $0x18] sm:$0xff]   ;;  %v1246_v8 = vld [vmem:[#allocation5 + $0x20] sm:$0xff]   ;;  %s1015_s13 = sshll.u32 %s1514_s22, 10  ;;  %s1016_s9 = sshll.u32 %s1514_s22, 11 }
  0x6e   : > { %1129 = vmatpush3.bf16.msra.mxu1 %v1239_v1  ;;  %1098 = vmatprep.subr.bf16.mxu0 %v1240_v2  ;;  %v1245_v7 = vld [vmem:[#allocation7 + $0x18] sm:$0xff]   ;;  %v1247_v9 = vld [vmem:[#allocation7 + $0x20] sm:$0xff]   ;;  %v1248_v10 = vld [vmem:[#allocation5 + $0x28] sm:$0xff]   ;;  %s1748_s17 = scalar_lea.hbm %s1838_s4, %s1015_s13  ;;  %s811_s7 = sshll.u32 %s1706_s16, 4  ;;  %s1763_s7 = int_to_ptr.vmem [resolvable:$true] %s811_s7 }
  0x6f   : > { %1130 = vmatprep.subr.bf16.mxu1 %v1241_v3  ;;  %v1254_v11 = vld [vmem:[%s1680_s12] sm:$0xff]   ;;  %v1249_v12 = vld [vmem:[#allocation7 + $0x28] sm:$0xff]   ;;  %v1250_v13 = vld [vmem:[#allocation5 + $0x30] sm:$0xff]   ;;  %s1758_s8 = scalar_lea.hbm %s1839_s5, %s1016_s9  ;;  %s1348_s24 = scalar_lea.vmem %s1742_s28, 1024 }
  0x70   : > { %1112 = vmatprep.mubr.bf16.mxu0 %v1254_v11  ;;  %1144 = vmatprep.mubr.bf16.mxu1 %v1254_v11  ;;  %v1251_v14 = vld [vmem:[#allocation7 + $0x30] sm:$0xff]   ;;  %v1252_v15 = vld [vmem:[#allocation5 + $0x38] sm:$0xff]   ;;  %v1255_v17 = vld [vmem:[%s1680_s12 + $0x8] sm:$0xff]   ;;  %p1349_p11 = scmp.ne.s32.totalorder %s1742_s28, %s1348_s24  ;;  %p1853_p0 = scmp.ne.s32.totalorder %s1848_s23, 0 }
  0x71   : > { %1099 = vmatpush3.bf16.msra.mxu0 %v1240_v2  ;;  %v1253_v16 = vld [vmem:[#allocation7 + $0x38] sm:$0xff]   ;;  %v1256_v18 = vld [vmem:[%s1680_s12 + $0x10] sm:$0xff]   ;;  %v1258_v20 = vld [vmem:[%s1680_s12 + $0x20] sm:$0xff]   ;;  %s1457_s26 = smov [#allocation8]  }
  0x72   : > { %1131 = vmatpush3.bf16.msra.mxu1 %v1241_v3  ;;  %1100 = vmatprep.subr.bf16.mxu0 %v1242_v4  ;;  %v1257_v19 = vld [vmem:[%s1680_s12 + $0x18] sm:$0xff]   ;;  %v1259_v21 = vld [vmem:[%s1680_s12 + $0x28] sm:$0xff]   ;;  %v1260_v22 = vld [vmem:[%s1680_s12 + $0x30] sm:$0xff]   ;;  %p1350_p2 = pnand %p1349_p11, %p1853_p0  ;;  %s1352_s15 = sshll.u32 %s1457_s26, 4  ;;  %s1353_s15 = int_to_ptr.vmem [resolvable:$false] %s1352_s15 }
  0x73   : > { %1132 = vmatprep.subr.bf16.mxu1 %v1243_v5  ;;  %v1261_v23 = vld [vmem:[%s1680_s12 + $0x38] sm:$0xff]   ;;  %v1702_v24 = vld [vmem:[%s1837_s3] ss:$0 sm:$0xff]  ;;  %s777_s12 = scalar_lea.sflag [#allocation4], %s1674_s14  ;;  %s1354_s13 = scalar_lea.vmem %s1353_s15, 2048 }
  0x74   : > { %p1351_p3 = pneg %p1350_p2  ;;  %p1355_p7 = scmp.lt.s32.totalorder %s1742_s28, %s1353_s15 }
  0x75   : > { %1101 = vmatpush3.bf16.msra.mxu0 %v1242_v4  ;;  %p1356_p9 = scmp.lt.s32.totalorder %s1354_s13, %s1348_s24 }
  0x76   : > { %1133 = vmatpush3.bf16.msra.mxu1 %v1243_v5  ;;  %1102 = vmatprep.subr.bf16.mxu0 %v1244_v6 }
  0x77   : > { %1134 = vmatprep.subr.bf16.mxu1 %v1245_v7  ;;  %p1357_p12 = por %p1356_p9, %p1355_p7 }
  0x79   : > { %1103 = vmatpush3.bf16.msra.mxu0 %v1244_v6  ;;  %p1358_p1 = pnand %p1357_p12, %p1351_p3 }
  0x7a   : > { %1135 = vmatpush3.bf16.msra.mxu1 %v1245_v7  ;;  %1104 = vmatprep.subr.bf16.mxu0 %v1246_v8 }
  0x7b   : > { %1136 = vmatprep.subr.bf16.mxu1 %v1247_v9 }
  0x7d   : > { %1105 = vmatpush3.bf16.msra.mxu0 %v1246_v8 }
  0x7e   : > { %1137 = vmatpush3.bf16.msra.mxu1 %v1247_v9  ;;  %1106 = vmatprep.subr.bf16.mxu0 %v1248_v10 }
  0x7f   : > { %1138 = vmatprep.subr.bf16.mxu1 %v1249_v12 }
  0x81   : > { %1107 = vmatpush3.bf16.msra.mxu0 %v1248_v10 }
  0x82   : > { %1139 = vmatpush3.bf16.msra.mxu1 %v1249_v12  ;;  %1108 = vmatprep.subr.bf16.mxu0 %v1250_v13 }
  0x83   : > { %1140 = vmatprep.subr.bf16.mxu1 %v1251_v14 }
  0x85   : > { %1109 = vmatpush3.bf16.msra.mxu0 %v1250_v13 }
  0x86   : > { %1141 = vmatpush3.bf16.msra.mxu1 %v1251_v14  ;;  %1110 = vmatprep.subr.bf16.mxu0 %v1252_v15 }
  0x87   : > { %1142 = vmatprep.subr.bf16.mxu1 %v1253_v16 }
  0x89   : > { %1111 = vmatpush3.bf16.msra.mxu0 %v1252_v15 }
  0x8a   : > { %1143 = vmatpush3.bf16.msra.mxu1 %v1253_v16 }
  0x8c   : > { %1113 = vmatmul.mubr.bf16.vlgmr.msra.gmra.mrb[0].mxu0 %v1255_v17 }
  0x8d   : > { %1145 = vmatmul.mubr.bf16.vlgmr.msra.gmra.mrb[0].mxu1 %v1255_v17  ;;  %1116 = vmatprep.mubr.bf16.mxu0 %v1256_v18 }
  0x8e   : > { %1148 = vmatprep.mubr.bf16.mxu1 %v1256_v18 }
  0x94   : > { %1117 = vmatmul.mubr.bf16.gmra.mrb[4].mxu0 %v1257_v19 }
  0x95   : > { %1149 = vmatmul.mubr.bf16.gmra.mrb[4].mxu1 %v1257_v19  ;;  %1120 = vmatprep.mubr.bf16.mxu0 %v1258_v20 }
  0x96   : > { %1152 = vmatprep.mubr.bf16.mxu1 %v1258_v20 }
  0x9c   : > { %1121 = vmatmul.mubr.bf16.gmra.mrb[8].mxu0 %v1259_v21 }
  0x9d   : > { %1153 = vmatmul.mubr.bf16.gmra.mrb[8].mxu1 %v1259_v21  ;;  %1124 = vmatprep.mubr.bf16.mxu0 %v1260_v22 }
  0x9e   : > { %1156 = vmatprep.mubr.bf16.mxu1 %v1260_v22 }
  0xa4   : > { %1125 = vmatmul.mubr.bf16.gmra.mrb[12].mxu0 %v1261_v23 }
  0xa5   : > { %1157 = vmatmul.mubr.bf16.gmra.mrb[12].mxu1 %v1261_v23 }
 0x15f   : > { %v1114_v25 = vpop.f32.mrb[0].mxu0 }
 0x160   : > { %v1146_v26 = vpop.f32.mrb[0].mxu1  ;;  %v449_v27 = vpop.f32.mrb[1].mxu0 }
 0x161   : > { %v626_v28 = vadd.f32 %v1146_v26, %v1702_v24  ;;  %v617_v29 = vpop.f32.mrb[1].mxu1  ;;  %v1115_v30 = vpop.f32.mrb[2].mxu0 }
 0x162   : > { %v618_v31 = vadd.f32 %v1702_v24, %v617_v29  ;;  %v1025_v32 = vpack.c.bf16 %v1115_v30, %v1114_v25  ;;  %v1147_v33 = vpop.f32.mrb[2].mxu1  ;;  %v452_v34 = vpop.f32.mrb[3].mxu0 }
 0x163   : > { %762 = vst [vmem:[%s1706_s16 + $0x10] sm:$0xff] %v626_v28  ;;  %v629_v35 = vadd.f32 %v1147_v33, %v1702_v24  ;;  %v1020_v36 = vpack.c.bf16 %v452_v34, %v449_v27  ;;  %v620_v37 = vpop.f32.mrb[3].mxu1 }
 0x164   : > { %760 = vst [vmem:[%s1706_s16] sm:$0xff] %v618_v31  ;;  %1057 = vst [vmem:[%s1713_s10 + $0x8] sm:$0xff] %v1025_v32   ;;  %v621_v38 = vadd.f32 %v1702_v24, %v620_v37 }
 0x165   : > { %763 = vst [vmem:[%s1706_s16 + $0x18] sm:$0xff] %v629_v35  ;;  %1021 = vst [vmem:[%s1713_s10] sm:$0xff] %v1020_v36  }
 0x166   : > { %761 = vst [vmem:[%s1706_s16 + $0x8] sm:$0xff] %v621_v38 }
 0x167   : > { %v1118_v39 = vpop.f32.mrb[4].mxu0 }
 0x168   : > { %v1150_v40 = vpop.f32.mrb[4].mxu1  ;;  %v465_v41 = vpop.f32.mrb[5].mxu0 }
 0x169   : > { %v642_v42 = vadd.f32 %v1150_v40, %v1702_v24  ;;  %v633_v43 = vpop.f32.mrb[5].mxu1  ;;  %v1119_v44 = vpop.f32.mrb[6].mxu0 }
 0x16a   : > { %v634_v45 = vadd.f32 %v1702_v24, %v633_v43  ;;  %v1035_v46 = vpack.c.bf16 %v1119_v44, %v1118_v39  ;;  %v1151_v47 = vpop.f32.mrb[6].mxu1  ;;  %v468_v48 = vpop.f32.mrb[7].mxu0 }
 0x16b   : > { %766 = vst [vmem:[%s1706_s16 + $0x30] sm:$0xff] %v642_v42  ;;  %v645_v49 = vadd.f32 %v1151_v47, %v1702_v24  ;;  %v1030_v50 = vpack.c.bf16 %v468_v48, %v465_v41  ;;  %v636_v51 = vpop.f32.mrb[7].mxu1 }
 0x16c   : > { %764 = vst [vmem:[%s1706_s16 + $0x20] sm:$0xff] %v634_v45  ;;  %1059 = vst [vmem:[%s1713_s10 + $0x18] sm:$0xff] %v1035_v46   ;;  %v637_v52 = vadd.f32 %v1702_v24, %v636_v51 }
 0x16d   : > { %767 = vst [vmem:[%s1706_s16 + $0x38] sm:$0xff] %v645_v49  ;;  %1058 = vst [vmem:[%s1713_s10 + $0x10] sm:$0xff] %v1030_v50  }
 0x16e   : > { %765 = vst [vmem:[%s1706_s16 + $0x28] sm:$0xff] %v637_v52 }
 0x16f   : > { %v1122_v53 = vpop.f32.mrb[8].mxu0 }
 0x170   : > { %v1154_v54 = vpop.f32.mrb[8].mxu1  ;;  %v481_v55 = vpop.f32.mrb[9].mxu0 }
 0x171   : > { %v658_v56 = vadd.f32 %v1154_v54, %v1702_v24  ;;  %v649_v57 = vpop.f32.mrb[9].mxu1  ;;  %v1123_v58 = vpop.f32.mrb[10].mxu0 }
 0x172   : > { %v650_v59 = vadd.f32 %v1702_v24, %v649_v57  ;;  %v1045_v60 = vpack.c.bf16 %v1123_v58, %v1122_v53  ;;  %v1155_v61 = vpop.f32.mrb[10].mxu1  ;;  %v484_v62 = vpop.f32.mrb[11].mxu0 }
 0x173   : > { %770 = vst [vmem:[%s1706_s16 + $0x50] sm:$0xff] %v658_v56  ;;  %v661_v63 = vadd.f32 %v1155_v61, %v1702_v24  ;;  %v1040_v0 = vpack.c.bf16 %v484_v62, %v481_v55  ;;  %v652_v1 = vpop.f32.mrb[11].mxu1 }
 0x174   : > { %768 = vst [vmem:[%s1706_s16 + $0x40] sm:$0xff] %v650_v59  ;;  %1061 = vst [vmem:[%s1713_s10 + $0x28] sm:$0xff] %v1045_v60   ;;  %v653_v2 = vadd.f32 %v1702_v24, %v652_v1 }
 0x175   : > { %771 = vst [vmem:[%s1706_s16 + $0x58] sm:$0xff] %v661_v63  ;;  %1060 = vst [vmem:[%s1713_s10 + $0x20] sm:$0xff] %v1040_v0  }
 0x176   : > { %769 = vst [vmem:[%s1706_s16 + $0x48] sm:$0xff] %v653_v2 }
 0x177   : > { %v1126_v3 = vpop.f32.mrb[12].mxu0 }
 0x178   : > { %v1158_v4 = vpop.f32.mrb[12].mxu1  ;;  %v497_v5 = vpop.f32.mrb[13].mxu0 }
 0x179   : > { %v674_v6 = vadd.f32 %v1158_v4, %v1702_v24  ;;  %v665_v7 = vpop.f32.mrb[13].mxu1  ;;  %v1127_v8 = vpop.f32.mrb[14].mxu0 }
 0x17a   : > { %v666_v9 = vadd.f32 %v1702_v24, %v665_v7  ;;  %v1055_v10 = vpack.c.bf16 %v1127_v8, %v1126_v3  ;;  %v1159_v11 = vpop.f32.mrb[14].mxu1  ;;  %v500_v12 = vpop.f32.mrb[15].mxu0 }
 0x17b   : > { %774 = vst [vmem:[%s1706_s16 + $0x70] sm:$0xff] %v674_v6  ;;  %v677_v13 = vadd.f32 %v1159_v11, %v1702_v24  ;;  %v1050_v14 = vpack.c.bf16 %v500_v12, %v497_v5  ;;  %v668_v15 = vpop.f32.mrb[15].mxu1 }
 0x17c   : > { %772 = vst [vmem:[%s1706_s16 + $0x60] sm:$0xff] %v666_v9  ;;  %1063 = vst [vmem:[%s1713_s10 + $0x38] sm:$0xff] %v1055_v10   ;;  %v669_v16 = vadd.f32 %v1702_v24, %v668_v15 }
 0x17d   : > { %775 = vst [vmem:[%s1706_s16 + $0x78] sm:$0xff] %v677_v13  ;;  %1062 = vst [vmem:[%s1713_s10 + $0x30] sm:$0xff] %v1050_v14  }
 0x17e   : > { %773 = vst [vmem:[%s1706_s16 + $0x68] sm:$0xff] %v669_v16 }
 0x17f   : > { %1361 = shalt.err (!%p1358_p1)
}
 0x180   : > { %s1362_s16 = scalar_lea.hbm %s1748_s17, 1024  ;;  %s1366_s30 = scalar_lea.hbm %s1838_s4, 2048 }
 0x181   : > { %p1363_p13 = scmp.ne.s32.totalorder %s1748_s17, %s1362_s16  ;;  %p1367_p4 = scmp.lt.u32.totalorder %s1748_s17, %s1838_s4 }
 0x182   : > { %p1368_p5 = scmp.lt.u32.totalorder %s1366_s30, %s1362_s16  ;;  %p1370_p11 = scmp.lt.u32.totalorder %s1362_s16, %s1748_s17 }
 0x183   : > { %p1364_p6 = pnand %p1363_p13, %p1853_p0 }
 0x184   : > { %p1369_p8 = por %p1368_p5, %p1367_p4 }
 0x185   : > { %p1365_p10 = pneg %p1364_p6 }
 0x186   : > { %p1371_p2 = por %p1370_p11, %p1369_p8 }
 0x188   : > { %p1372_p3 = pnand %p1371_p2, %p1365_p10 }
 0x18a   : > { %1375 = shalt.err (!%p1372_p3)
}
 0x18b   : > { %s1458_s6 = smov 64   ;;  %s1459_s24 = smov 4  }
 0x18c   : > { %1170 = dma.vmem_to_hbm [thread:$0]  (%p1853_p0), %s1742_s28, 1024, %s1748_s17, %s777_s12, %s1458_s6, %s1458_s6, %s1459_s24  }
 0x18d   : > { %s782_s26 = scalar_lea.sflag [#allocation10], %s1674_s14  ;;  %s1376_s15 = scalar_lea.vmem %s1763_s7, 2048 }
 0x18e   : > { %p1377_p7 = scmp.ne.s32.totalorder %s1763_s7, %s1376_s15  ;;  %s1460_s13 = smov [#allocation9]  }
 0x18f   : > { %s1380_s16 = sshll.u32 %s1460_s13, 4  ;;  %s1381_s16 = int_to_ptr.vmem [resolvable:$false] %s1380_s16 }
 0x190   : > { %p1378_p9 = pnand %p1377_p7, %p1853_p0  ;;  %s1382_s10 = scalar_lea.vmem %s1381_s16, 4096 }
 0x191   : > { %p1383_p1 = scmp.lt.s32.totalorder %s1763_s7, %s1381_s16  ;;  %p1384_p13 = scmp.lt.s32.totalorder %s1382_s10, %s1376_s15 }
 0x192   : > { %p1379_p12 = pneg %p1378_p9 }
 0x193   : > { %p1385_p6 = por %p1384_p13, %p1383_p1 }
 0x195   : > { %p1386_p10 = pnand %p1385_p6, %p1379_p12 }
 0x197   : > { %1389 = shalt.err (!%p1386_p10)
}
 0x198   : > { %s1390_s28 = scalar_lea.hbm %s1758_s8, 2048  ;;  %s1394_s9 = scalar_lea.hbm %s1839_s5, 4096 }
 0x199   : > { %p1391_p4 = scmp.ne.s32.totalorder %s1758_s8, %s1390_s28  ;;  %p1395_p11 = scmp.lt.u32.totalorder %s1758_s8, %s1839_s5 }
 0x19a   : > { %p1396_p2 = scmp.lt.u32.totalorder %s1394_s9, %s1390_s28  ;;  %p1398_p7 = scmp.lt.u32.totalorder %s1390_s28, %s1758_s8 }
 0x19b   : > { %p1392_p5 = pnand %p1391_p4, %p1853_p0 }
 0x19c   : > { %p1397_p3 = por %p1396_p2, %p1395_p11 }
 0x19d   : > { %p1393_p8 = pneg %p1392_p5 }
 0x19e   : > { %p1399_p9 = por %p1398_p7, %p1397_p3 }
 0x1a0   : > { %p1400_p12 = pnand %p1399_p9, %p1393_p8 }
 0x1a2   : > { %1403 = shalt.err (!%p1400_p12)
}
 0x1a3   : > { %s1461_s22 = smov 128   ;;  %s1462_s6 = smov 8  }
 0x1a4   : > { %1171 = dma.vmem_to_hbm [thread:$0]  (%p1853_p0), %s1763_s7, 2048, %s1758_s8, %s782_s26, %s1461_s22, %s1461_s22, %s1462_s6  }
 0x1a5 PF: > { %s826_s24 = sand.u32 1, %s1438_s18   ;;  %p1854_p1 = scmp.ne.s32.totalorder %s1844_s25, 0 }
 0x1a6   : > { %p1855_p13 = scmp.ge.s32.totalorder %s1450_s21, 2  ;;  %s827_s15 = scalar_lea.sflag [#allocation4], %s826_s24 }
 0x1a8   : > { %p1186_p6 = pnand %p1855_p13, %p1854_p1 }
 0x1aa   : > { %1429 = dma.done.wait (!%p1186_p6), %s827_s15, 1024  }
 0x1ab   : > { %1431 = vsyncadd (!%p1186_p6), %s827_s15, 4294966272  ;;  %s836_s13 = scalar_lea.sflag [#allocation10], %s826_s24 }
 0x1ac   : > { %1433 = dma.done.wait (!%p1186_p6), %s836_s13, 2048  }
 0x1ad   : > { %1435 = vsyncadd (!%p1186_p6), %s836_s13, 4294965248  ;;  %p23_p0 = scmp.ge.s32.totalorder %s1609_s29, 4   ;;  %s1856_s18 = smov %s1442_s19 }
 0x1ae   : > { %s1857_s19 = smov %s1446_s20  ;;  %s1858_s20 = smov %s1625_s27 }
 0x1af   : > { %s1859_s21 = smov %s1609_s29  ;;  %25 = sbr.rel (!%p23_p0) target bundleno = 8 (0x8), region = 106 }
 0x1b6   :  { %841 = vsyncpa [#allocation3], 1 }
 0x1b7   :  { %843 = vsyncpa [#allocation3 + $0x1], 1 }
 0x1b8   :  { %844 = vsyncpa [#allocation6], 1 }
 0x1b9   :  { %845 = vsyncpa [#allocation4], 1 }
 0x1ba   :  { %847 = vsyncpa [#allocation4 + $0x1], 1 }
 0x1bb   :  { %848 = vsyncpa [#allocation10], 1 }
 0x1bc   :  { %850 = vsyncpa [#allocation10 + $0x1], 1 }

</bundles_post_ra>
